<compile_context>
chip_gen: v7x
topology: tpu7x:2x2x1
jax: 0.10.0
libtpu: 0.0.40
codegen_flags: <defaults>
</compile_context>

<pallas_src>
import functools
import math

import jax
import jax.numpy as jnp
from jax.experimental import pallas as pl
from jax.experimental.pallas import tpu as pltpu

BN_EPS = 1e-5
LANE = 128


def _round_up(n, m):
    return ((n + m - 1) // m) * m


# ----------------------------- Pallas kernel -------------------------------

def _mlp_fused_kernel(*refs, num_hidden):
    """Fused MLP forward.

    refs layout (inputs, then output, then scratch):
      refs[0]                     : x        (B, in_pad)        bf16
      refs[1 .. num_hidden]       : w_hid_i  (pad_i, H_pad)     bf16 (pre-transposed)
      refs[1 + num_hidden]        : gamma    (1, H_pad)         f32
      refs[2 + num_hidden]        : beta     (1, H_pad)         f32
      refs[3 + num_hidden]        : w_last   (H_pad, TN) tile   bf16
      refs[4 + num_hidden]        : b_last   (1, TN)     tile   f32
      refs[5 + num_hidden]        : out      (B, TN)     tile   f32
      refs[6 + num_hidden]        : h_scratch(B, H_pad)         bf16 (VMEM)
    """
    x_ref = refs[0]
    w_hid = refs[1:1 + num_hidden]
    gamma_ref = refs[1 + num_hidden]
    beta_ref = refs[2 + num_hidden]
    wl_ref = refs[3 + num_hidden]
    bl_ref = refs[4 + num_hidden]
    o_ref = refs[5 + num_hidden]
    h_ref = refs[6 + num_hidden]

    # Hidden stack (Linear [no bias] -> folded BN -> ReLU), computed once and
    # cached in VMEM scratch; reused for every output-feature tile.
    @pl.when(pl.program_id(0) == 0)
    def _compute_hidden_stack():
        gamma = gamma_ref[...]                       # (1, H_pad) f32
        beta = beta_ref[...]                         # (1, H_pad) f32
        h = x_ref[...]                               # bf16 activations
        inv_n = 1.0 / h.shape[0]                     # batch un-tiled -> exact stats
        for i in range(num_hidden):                  # static Python unroll
            # MXU: bf16 operands, f32 accumulation; no in-kernel transpose.
            y = jnp.dot(h, w_hid[i][...], preferred_element_type=jnp.float32)
            # BatchNorm1d (training-mode, biased variance) folded to one FMA.
            mean = jnp.sum(y, axis=0, keepdims=True) * inv_n
            ex2 = jnp.sum(y * y, axis=0, keepdims=True) * inv_n
            var = ex2 - mean * mean
            scale = jax.lax.rsqrt(var + BN_EPS) * gamma   # EUP rsqrt, ~free
            shift = beta - mean * scale
            h = jnp.maximum(y * scale + shift, 0.0)       # BN + ReLU, f32 math
            h = h.astype(jnp.bfloat16)                    # cast once per layer
        h_ref[...] = h

    # Final Linear (bias kept), one lane-dense output tile per grid step.
    o_ref[...] = (
        jnp.dot(h_ref[...], wl_ref[...], preferred_element_type=jnp.float32)
        + bl_ref[...]
    ).astype(o_ref.dtype)


# ------------------------------ Host wrapper --------------------------------

@jax.jit
def mlp_forward(x, weights, biases, gamma, beta):
    """x: (B, in_f) f32.  weights[i]: (out_f, in_f) f32 (PyTorch layout);
    biases[i]: (out_f,) f32; gamma/beta: (h_sizes[1],) f32 (shared BN)."""
    num_layers = len(weights)
    assert num_layers >= 2, "need at least one hidden layer + final Linear"
    num_hidden = num_layers - 1

    B, in_f = x.shape
    dims = [in_f] + [int(w.shape[0]) for w in weights]
    # Shared BatchNorm1d(h_sizes[1]) must match every hidden output width.
    for i in range(1, num_layers):
        assert dims[i] == dims[1], (
            "shared BatchNorm1d requires all hidden widths == h_sizes[1]")

    pdims = [_round_up(d, LANE) for d in dims]       # lane-dense feature dims
    out_f, out_pad = dims[-1], pdims[-1]
    H_pad = pdims[1]

    # --- pad + transpose + cast parameters (zero padding is exactly neutral).
    w_list = []
    for i, w in enumerate(weights):
        wt = jnp.pad(w.T, ((0, pdims[i] - dims[i]), (0, pdims[i + 1] - dims[i + 1])))
        w_list.append(wt.astype(jnp.bfloat16))       # [in_pad, out_pad] bf16
    x_p = jnp.pad(x, ((0, 0), (0, pdims[0] - dims[0]))).astype(jnp.bfloat16)
    gamma_p = jnp.pad(gamma.astype(jnp.float32), (0, H_pad - dims[1])).reshape(1, H_pad)
    beta_p = jnp.pad(beta.astype(jnp.float32), (0, H_pad - dims[1])).reshape(1, H_pad)
    # Hidden biases are algebraically dead (cancelled by BN mean subtraction);
    # only the final Linear bias is passed to the kernel.
    b_last = jnp.pad(biases[-1].astype(jnp.float32),
                     (0, out_pad - out_f)).reshape(1, out_pad)

    # --- lane-dense output-feature tiling of the final layer.
    TN = 256 if out_pad % 256 == 0 else 128
    n_tiles = out_pad // TN

    args = [x_p]
    in_specs = [pl.BlockSpec((B, pdims[0]), lambda j: (0, 0))]
    for i in range(num_hidden):
        args.append(w_list[i])
        in_specs.append(pl.BlockSpec(w_list[i].shape, lambda j: (0, 0)))
    args += [gamma_p, beta_p, w_list[-1], b_last]
    in_specs += [
        pl.BlockSpec((1, H_pad), lambda j: (0, 0)),
        pl.BlockSpec((1, H_pad), lambda j: (0, 0)),
        pl.BlockSpec((pdims[-2], TN), lambda j: (0, j)),   # streamed weight tiles
        pl.BlockSpec((1, TN), lambda j: (0, j)),
    ]
    out_specs = pl.BlockSpec((B, TN), lambda j: (0, j))    # lane-dense stores

    # --- VMEM budget (resident blocks + double-buffered streamed tiles).
    resident_bytes = (
        x_p.size * 2
        + sum(w.size * 2 for w in w_list[:-1])
        + (gamma_p.size + beta_p.size) * 4
        + 2 * (pdims[-2] * TN * 2)          # final-weight tile, double-buffered
        + 2 * (TN * 4)                      # final-bias tile
        + 2 * (B * TN * 4)                  # output tile
        + B * pdims[-2] * 2                 # hidden-activation scratch (bf16)
    )
    vmem_limit = int(min(max(4 * resident_bytes, 16 << 20), 48 << 20))

    cost = pl.CostEstimate(
        flops=2 * B * sum(pdims[i] * pdims[i + 1] for i in range(num_layers))
        + 10 * num_hidden * B * H_pad,
        transcendentals=num_hidden * H_pad,
        bytes_accessed=x_p.size * 2 + sum(w.size * 2 for w in w_list)
        + (gamma_p.size + beta_p.size + b_last.size) * 4 + B * out_pad * 4,
    )

    kernel = functools.partial(_mlp_fused_kernel, num_hidden=num_hidden)
    out_padded = pl.pallas_call(
        kernel,
        out_shape=jax.ShapeDtypeStruct((B, out_pad), jnp.float32),
        grid_spec=pltpu.PrefetchScalarGridSpec(
            num_scalar_prefetch=0,
            grid=(n_tiles,),
            in_specs=in_specs,
            out_specs=out_specs,
            scratch_shapes=[pltpu.VMEM((B, pdims[-2]), jnp.bfloat16)],
        ),
        # "arbitrary": the hidden-activation scratch is written on step 0 and
        # reused on later steps (sequential).  On v7x one could mark this
        # "parallel" for dual-TC use only by recomputing the hidden stack per
        # output tile.
        compiler_params=pltpu.CompilerParams(
            dimension_semantics=("arbitrary",),
            vmem_limit_bytes=vmem_limit,
        ),
        cost_estimate=cost,
    )(*args)

    return out_padded[:, :out_f]             # drop lane padding on the host


# ----------------------- Init + pure-JAX reference ---------------------------

def init_mlp_params(h_sizes, key):
    """PyTorch defaults: Linear U(-1/sqrt(fan_in)); BN gamma=1, beta=0."""
    weights, biases = [], []
    for k in range(len(h_sizes) - 1):
        key, wk, bk = jax.random.split(key, 3)
        fan_in, fan_out = h_sizes[k], h_sizes[k + 1]
        bound = 1.0 / math.sqrt(fan_in)
        weights.append(jax.random.uniform(wk, (fan_out, fan_in), jnp.float32, -bound, bound))
        biases.append(jax.random.uniform(bk, (fan_out,), jnp.float32, -bound, bound))
    gamma = jnp.ones((h_sizes[1],), jnp.float32)
    beta = jnp.zeros((h_sizes[1],), jnp.float32)
    return tuple(weights), tuple(biases), gamma, beta


def mlp_reference(x, weights, biases, gamma, beta):
    """Pure-JAX reference with full module semantics (hidden biases kept,
    unfused BN) and the same dtype policy (bf16 MXU operands, f32 BN math)."""
    num_layers = len(weights)
    h = x
    for i in range(num_layers):
        w_t = weights[i].T.astype(jnp.bfloat16)
        y = jnp.dot(h.astype(jnp.bfloat16), w_t,
                    preferred_element_type=jnp.float32) + biases[i]
        if i != num_layers - 1:
            mean = jnp.mean(y, axis=0, keepdims=True)
            var = jnp.mean((y - mean) ** 2, axis=0, keepdims=True)
            y = (y - mean) * jax.lax.rsqrt(var + BN_EPS) * gamma + beta
            y = jnp.maximum(y, 0.0)
        h = y
    return h


if __name__ == "__main__":
    # Intermediate widths all equal h_sizes[1] so the shared
    # BatchNorm1d(num_features=h_sizes[1]) applies to every hidden output,
    # matching the PyTorch module's implicit constraint.
    h_sizes = [16, 32, 32, 8]
    batch = 8

    key = jax.random.PRNGKey(0)
    key, pk, xk = jax.random.split(key, 3)
    weights, biases, gamma, beta = init_mlp_params(h_sizes, pk)
    x = jax.random.normal(xk, (batch, h_sizes[0]), jnp.float32)

    out = mlp_forward(x, weights, biases, gamma, beta)
    jax.block_until_ready(out)

    assert out.shape == (batch, h_sizes[-1])
    ref = mlp_reference(x, weights, biases, gamma, beta)
    assert bool(jnp.all(jnp.isfinite(out)))
    assert bool(jnp.allclose(out, ref, atol=2e-2, rtol=2e-2)), "mismatch vs reference"
    print("KERNEL_OK")
</pallas_src>

<mosaic_0001>
module attributes {stable_mosaic.version = 11 : i64} {
  func.func @_mlp_fused_kernel(%arg0: i32, %arg1: memref<8x128xbf16, #tpu.memory_space<vmem>>, %arg2: memref<128x128xbf16, #tpu.memory_space<vmem>>, %arg3: memref<128x128xbf16, #tpu.memory_space<vmem>>, %arg4: memref<1x128xf32, #tpu.memory_space<vmem>>, %arg5: memref<1x128xf32, #tpu.memory_space<vmem>>, %arg6: memref<128x128xbf16, #tpu.memory_space<vmem>>, %arg7: memref<1x128xf32, #tpu.memory_space<vmem>>, %arg8: memref<8x128xf32, #tpu.memory_space<vmem>>, %arg9: memref<8x128xbf16, #tpu.memory_space<vmem>>) attributes {dimension_semantics = [#tpu.dimension_semantics<arbitrary>], iteration_bounds = array<i64: 1>, scalar_prefetch = 0 : i64, scratch_operands = 1 : i64, tpu.core_type = #tpu.core_type<tc>, window_params = [{pipeline_mode = #tpu.pipeline_mode<synchronous>, transform_indices = @transform_0, window_bounds = array<i64: 8, 128>}, {pipeline_mode = #tpu.pipeline_mode<synchronous>, transform_indices = @transform_1, window_bounds = array<i64: 128, 128>}, {pipeline_mode = #tpu.pipeline_mode<synchronous>, transform_indices = @transform_2, window_bounds = array<i64: 128, 128>}, {pipeline_mode = #tpu.pipeline_mode<synchronous>, transform_indices = @transform_3, window_bounds = array<i64: 1, 128>}, {pipeline_mode = #tpu.pipeline_mode<synchronous>, transform_indices = @transform_4, window_bounds = array<i64: 1, 128>}, {transform_indices = @transform_5, window_bounds = array<i64: 128, 128>}, {transform_indices = @transform_6, window_bounds = array<i64: 1, 128>}, {transform_indices = @transform_7, window_bounds = array<i64: 8, 128>}]} {
    %c0_i32 = arith.constant 0 : i32
    %0 = arith.cmpi eq, %arg0, %c0_i32 : i32
    %1 = arith.extui %0 : i1 to i32
    %c0_i32_0 = arith.constant 0 : i32
    %2 = arith.cmpi ne, %1, %c0_i32_0 : i32
    scf.if %2 {
      %c0_8 = arith.constant 0 : index
      %c0_9 = arith.constant 0 : index
      %10 = vector.load %arg4[%c0_8, %c0_9] : memref<1x128xf32, #tpu.memory_space<vmem>>, vector<1x128xf32>
      %c0_10 = arith.constant 0 : index
      %c0_11 = arith.constant 0 : index
      %11 = vector.load %arg5[%c0_10, %c0_11] : memref<1x128xf32, #tpu.memory_space<vmem>>, vector<1x128xf32>
      %c0_12 = arith.constant 0 : index
      %c0_13 = arith.constant 0 : index
      %12 = vector.load %arg1[%c0_12, %c0_13] : memref<8x128xbf16, #tpu.memory_space<vmem>>, vector<8x128xbf16>
      %c0_14 = arith.constant 0 : index
      %c0_15 = arith.constant 0 : index
      %13 = vector.load %arg2[%c0_14, %c0_15] : memref<128x128xbf16, #tpu.memory_space<vmem>>, vector<128x128xbf16>
      %cst_16 = arith.constant dense<0.000000e+00> : vector<8x128xf32>
      %14 = tpu.matmul %12, %13, %cst_16 {dimension_numbers = #tpu.dot_dimension_numbers<[1], [0], [0], [1], [0, 0, 1, 1], [], []>} : vector<8x128xbf16>, vector<128x128xbf16>, vector<8x128xf32> -> vector<8x128xf32>
      %cst_17 = arith.constant dense<0.000000e+00> : vector<128xf32>
      %15 = vector.multi_reduction <add>, %14, %cst_17 [0] : vector<8x128xf32> to vector<128xf32>
      %16 = vector.shape_cast %15 : vector<128xf32> to vector<1x128xf32>
      %cst_18 = arith.constant 1.250000e-01 : f32
      %17 = vector.broadcast %cst_18 : f32 to vector<1x128xf32>
      %18 = arith.mulf %16, %17 : vector<1x128xf32>
      %19 = arith.mulf %14, %14 : vector<8x128xf32>
      %cst_19 = arith.constant dense<0.000000e+00> : vector<128xf32>
      %20 = vector.multi_reduction <add>, %19, %cst_19 [0] : vector<8x128xf32> to vector<128xf32>
      %21 = vector.shape_cast %20 : vector<128xf32> to vector<1x128xf32>
      %cst_20 = arith.constant 1.250000e-01 : f32
      %22 = vector.broadcast %cst_20 : f32 to vector<1x128xf32>
      %23 = arith.mulf %21, %22 : vector<1x128xf32>
      %24 = arith.mulf %18, %18 : vector<1x128xf32>
      %25 = arith.subf %23, %24 : vector<1x128xf32>
      %cst_21 = arith.constant 9.99999974E-6 : f32
      %26 = vector.broadcast %cst_21 : f32 to vector<1x128xf32>
      %27 = arith.addf %25, %26 : vector<1x128xf32>
      %28 = math.rsqrt %27 : vector<1x128xf32>
      %29 = arith.mulf %28, %10 : vector<1x128xf32>
      %30 = arith.mulf %18, %29 : vector<1x128xf32>
      %31 = arith.subf %11, %30 : vector<1x128xf32>
      %32 = vector.broadcast %29 : vector<1x128xf32> to vector<8x128xf32>
      %33 = arith.mulf %14, %32 : vector<8x128xf32>
      %34 = vector.broadcast %31 : vector<1x128xf32> to vector<8x128xf32>
      %35 = arith.addf %33, %34 : vector<8x128xf32>
      %cst_22 = arith.constant 0.000000e+00 : f32
      %36 = vector.broadcast %cst_22 : f32 to vector<8x128xf32>
      %37 = arith.maximumf %35, %36 : vector<8x128xf32>
      %38 = arith.truncf %37 : vector<8x128xf32> to vector<8x128xbf16>
      %c0_23 = arith.constant 0 : index
      %c0_24 = arith.constant 0 : index
      %39 = vector.load %arg3[%c0_23, %c0_24] : memref<128x128xbf16, #tpu.memory_space<vmem>>, vector<128x128xbf16>
      %cst_25 = arith.constant dense<0.000000e+00> : vector<8x128xf32>
      %40 = tpu.matmul %38, %39, %cst_25 {dimension_numbers = #tpu.dot_dimension_numbers<[1], [0], [0], [1], [0, 0, 1, 1], [], []>} : vector<8x128xbf16>, vector<128x128xbf16>, vector<8x128xf32> -> vector<8x128xf32>
      %cst_26 = arith.constant dense<0.000000e+00> : vector<128xf32>
      %41 = vector.multi_reduction <add>, %40, %cst_26 [0] : vector<8x128xf32> to vector<128xf32>
      %42 = vector.shape_cast %41 : vector<128xf32> to vector<1x128xf32>
      %cst_27 = arith.constant 1.250000e-01 : f32
      %43 = vector.broadcast %cst_27 : f32 to vector<1x128xf32>
      %44 = arith.mulf %42, %43 : vector<1x128xf32>
      %45 = arith.mulf %40, %40 : vector<8x128xf32>
      %cst_28 = arith.constant dense<0.000000e+00> : vector<128xf32>
      %46 = vector.multi_reduction <add>, %45, %cst_28 [0] : vector<8x128xf32> to vector<128xf32>
      %47 = vector.shape_cast %46 : vector<128xf32> to vector<1x128xf32>
      %cst_29 = arith.constant 1.250000e-01 : f32
      %48 = vector.broadcast %cst_29 : f32 to vector<1x128xf32>
      %49 = arith.mulf %47, %48 : vector<1x128xf32>
      %50 = arith.mulf %44, %44 : vector<1x128xf32>
      %51 = arith.subf %49, %50 : vector<1x128xf32>
      %cst_30 = arith.constant 9.99999974E-6 : f32
      %52 = vector.broadcast %cst_30 : f32 to vector<1x128xf32>
      %53 = arith.addf %51, %52 : vector<1x128xf32>
      %54 = math.rsqrt %53 : vector<1x128xf32>
      %55 = arith.mulf %54, %10 : vector<1x128xf32>
      %56 = arith.mulf %44, %55 : vector<1x128xf32>
      %57 = arith.subf %11, %56 : vector<1x128xf32>
      %58 = vector.broadcast %55 : vector<1x128xf32> to vector<8x128xf32>
      %59 = arith.mulf %40, %58 : vector<8x128xf32>
      %60 = vector.broadcast %57 : vector<1x128xf32> to vector<8x128xf32>
      %61 = arith.addf %59, %60 : vector<8x128xf32>
      %cst_31 = arith.constant 0.000000e+00 : f32
      %62 = vector.broadcast %cst_31 : f32 to vector<8x128xf32>
      %63 = arith.maximumf %61, %62 : vector<8x128xf32>
      %64 = arith.truncf %63 : vector<8x128xf32> to vector<8x128xbf16>
      %c0_32 = arith.constant 0 : index
      %c0_33 = arith.constant 0 : index
      %65 = vector.load %arg9[%c0_32, %c0_33] : memref<8x128xbf16, #tpu.memory_space<vmem>>, vector<8x128xbf16>
      tpu.vector_store %arg9[%c0_32, %c0_33], %64 {strides = array<i32>} : memref<8x128xbf16, #tpu.memory_space<vmem>>, vector<8x128xbf16>,
    } else {
    }
    %c0 = arith.constant 0 : index
    %c0_1 = arith.constant 0 : index
    %3 = vector.load %arg9[%c0, %c0_1] : memref<8x128xbf16, #tpu.memory_space<vmem>>, vector<8x128xbf16>
    %c0_2 = arith.constant 0 : index
    %c0_3 = arith.constant 0 : index
    %4 = vector.load %arg6[%c0_2, %c0_3] : memref<128x128xbf16, #tpu.memory_space<vmem>>, vector<128x128xbf16>
    %cst = arith.constant dense<0.000000e+00> : vector<8x128xf32>
    %5 = tpu.matmul %3, %4, %cst {dimension_numbers = #tpu.dot_dimension_numbers<[1], [0], [0], [1], [0, 0, 1, 1], [], []>} : vector<8x128xbf16>, vector<128x128xbf16>, vector<8x128xf32> -> vector<8x128xf32>
    %c0_4 = arith.constant 0 : index
    %c0_5 = arith.constant 0 : index
    %6 = vector.load %arg7[%c0_4, %c0_5] : memref<1x128xf32, #tpu.memory_space<vmem>>, vector<1x128xf32>
    %7 = vector.broadcast %6 : vector<1x128xf32> to vector<8x128xf32>
    %8 = arith.addf %5, %7 : vector<8x128xf32>
    %c0_6 = arith.constant 0 : index
    %c0_7 = arith.constant 0 : index
    %9 = vector.load %arg8[%c0_6, %c0_7] : memref<8x128xf32, #tpu.memory_space<vmem>>, vector<8x128xf32>
    tpu.vector_store %arg8[%c0_6, %c0_7], %8 {strides = array<i32>} : memref<8x128xf32, #tpu.memory_space<vmem>>, vector<8x128xf32>,
    return
  }
  func.func @transform_0(%arg0: i32) -> (i32, i32) {
    %c0_i32 = arith.constant 0 : i32
    %c0_i32_0 = arith.constant 0 : i32
    %c0_i32_1 = arith.constant 0 : i32
    return %c0_i32, %c0_i32_0 : i32, i32
  }
  func.func @transform_1(%arg0: i32) -> (i32, i32) {
    %c0_i32 = arith.constant 0 : i32
    %c0_i32_0 = arith.constant 0 : i32
    %c0_i32_1 = arith.constant 0 : i32
    return %c0_i32, %c0_i32_0 : i32, i32
  }
  func.func @transform_2(%arg0: i32) -> (i32, i32) {
    %c0_i32 = arith.constant 0 : i32
    %c0_i32_0 = arith.constant 0 : i32
    %c0_i32_1 = arith.constant 0 : i32
    return %c0_i32, %c0_i32_0 : i32, i32
  }
  func.func @transform_3(%arg0: i32) -> (i32, i32) {
    %c0_i32 = arith.constant 0 : i32
    %c0_i32_0 = arith.constant 0 : i32
    %c0_i32_1 = arith.constant 0 : i32
    return %c0_i32, %c0_i32_0 : i32, i32
  }
  func.func @transform_4(%arg0: i32) -> (i32, i32) {
    %c0_i32 = arith.constant 0 : i32
    %c0_i32_0 = arith.constant 0 : i32
    %c0_i32_1 = arith.constant 0 : i32
    return %c0_i32, %c0_i32_0 : i32, i32
  }
  func.func @transform_5(%arg0: i32) -> (i32, i32) {
    %c0_i32 = arith.constant 0 : i32
    %c0_i32_0 = arith.constant 0 : i32
    return %c0_i32, %arg0 : i32, i32
  }
  func.func @transform_6(%arg0: i32) -> (i32, i32) {
    %c0_i32 = arith.constant 0 : i32
    %c0_i32_0 = arith.constant 0 : i32
    return %c0_i32, %arg0 : i32, i32
  }
  func.func @transform_7(%arg0: i32) -> (i32, i32) {
    %c0_i32 = arith.constant 0 : i32
    %c0_i32_0 = arith.constant 0 : i32
    return %c0_i32, %arg0 : i32, i32
  }
}

</mosaic_0001>

<bundles_post_ra>
// kernel: mlp_forward.1
= control target key start
LH: loop header
LB: loop body
LE: loop exit
PB: predicated region body
PF: predicated region fallthrough
CT: control target
= control target key end

     0   :  { %v610_v1 = vmov 0.0   ;;  %vm611_vm0 = vmmov 0   ;;  %s789_s0 = inlined_call_operand.vmem [shape: bf16[8,128], index: 0, kind: input, shape index: {}]   ;;  %s790_s1 = inlined_call_operand.vmem [shape: bf16[128,128], index: 1, kind: input, shape index: {}]   ;;  %s791_s2 = inlined_call_operand.vmem [shape: bf16[128,128], index: 2, kind: input, shape index: {}]   ;;  %s792_s3 = inlined_call_operand.vmem [shape: f32[1,128], index: 3, kind: input, shape index: {}]   ;;  %s793_s4 = inlined_call_operand.vmem [shape: f32[1,128], index: 4, kind: input, shape index: {}]   ;;  %s794_s5 = inlined_call_operand.vmem [shape: bf16[128,128], index: 5, kind: input, shape index: {}]   ;;  %s795_s6 = inlined_call_operand.vmem [shape: f32[1,128], index: 6, kind: input, shape index: {}]   ;;  %s796_s7 = inlined_call_operand.hbm [shape: f32[8,128], index: 7, kind: output, shape index: {}]  }
   0x1   :  { %v558_v0 = vld [vmem:[%s790_s1] sm:$0xff]   ;;  %495 = vmatprep.subr.bf16.mxu0 %v610_v1  ;;  %515 = vmatprep.subr.bf16.mxu1 %v610_v1  ;;  %v559_v2 = vld [vmem:[%s790_s1 + $0x8] sm:$0xff]   ;;  %v560_v3 = vld [vmem:[%s790_s1 + $0x10] sm:$0xff]  }
   0x2   :  { %496 = vmatpush3.bf16.msra.mxu0 %v558_v0  ;;  %511 = vmatprep.mubr.msk.bf16.mxu0 %vm611_vm0, %v610_v1  ;;  %v561_v4 = vld [vmem:[%s790_s1 + $0x18] sm:$0xff]   ;;  %v562_v5 = vld [vmem:[%s790_s1 + $0x20] sm:$0xff]   ;;  %v563_v6 = vld [vmem:[%s790_s1 + $0x28] sm:$0xff]  }
   0x3   :  { %497 = vmatprep.subr.bf16.mxu0 %v610_v1  ;;  %531 = vmatprep.mubr.msk.bf16.mxu1 %vm611_vm0, %v610_v1 }
   0x6   :  { %498 = vmatpush3.bf16.msra.mxu0 %v559_v2 }
   0x7   :  { %499 = vmatprep.subr.bf16.mxu0 %v610_v1 }
   0xa   :  { %500 = vmatpush3.bf16.msra.mxu0 %v560_v3 }
   0xb   :  { %501 = vmatprep.subr.bf16.mxu0 %v610_v1 }
   0xe   :  { %502 = vmatpush3.bf16.msra.mxu0 %v561_v4 }
   0xf   :  { %503 = vmatprep.subr.bf16.mxu0 %v610_v1 }
  0x12   :  { %504 = vmatpush3.bf16.msra.mxu0 %v562_v5 }
  0x13   :  { %505 = vmatprep.subr.bf16.mxu0 %v610_v1 }
  0x14   :  { %12 = vsyncpa [#allocation4], 0  ;;  %v564_v7 = vld [vmem:[%s790_s1 + $0x30] sm:$0xff]   ;;  %v565_v8 = vld [vmem:[%s790_s1 + $0x38] sm:$0xff]   ;;  %v161_v40 = vlaneseq  ;;  %s612_s26 = smov [#allocation3]  }
  0x15   :  { %v34_v9 = vld [vmem:[%s789_s0] sm:$0xf]  ;;  %v567_v11 = vld [vmem:[%s791_s2 + $0x8] sm:$0xff]   ;;  %v568_v12 = vld [vmem:[%s791_s2 + $0x10] sm:$0xff]   ;;  %s435_s27 = sshll.u32 %s612_s26, 4  ;;  %s436_s27 = int_to_ptr.vmem [resolvable:$true] %s435_s27 }
  0x16   :  { %506 = vmatpush3.bf16.msra.mxu0 %v563_v6  ;;  %v566_v10 = vld [vmem:[%s791_s2] sm:$0xff]   ;;  %v569_v13 = vld [vmem:[%s791_s2 + $0x18] sm:$0xff]   ;;  %v571_v15 = vld [vmem:[%s791_s2 + $0x28] sm:$0xff]   ;;  %v162_v41 = vshrl.u32 %v161_v40, 7  ;;  %s586_s28 = scalar_lea.vmem %s436_s27, 128  ;;  %p591_p1 = scmp.lt.s32.totalorder %s436_s27, %s436_s27 }
  0x17   :  { %507 = vmatprep.subr.bf16.mxu0 %v610_v1  ;;  %516 = vmatpush3.bf16.msra.mxu1 %v566_v10  ;;  %v570_v14 = vld [vmem:[%s791_s2 + $0x20] sm:$0xff]   ;;  %v572_v16 = vld [vmem:[%s791_s2 + $0x30] sm:$0xff]   ;;  %v573_v17 = vld [vmem:[%s791_s2 + $0x38] sm:$0xff]   ;;  %p587_p0 = scmp.ne.s32.totalorder %s436_s27, %s586_s28  ;;  %p592_p2 = scmp.lt.s32.totalorder %s586_s28, %s586_s28 }
  0x18   :  { %517 = vmatprep.subr.bf16.mxu1 %v610_v1  ;;  %v32_v42 = vld [vmem:[%s792_s3] sm:$0x1]  ;;  %v730_v43 = vsub.s32 0, %v162_v41  ;;  %v575_v56 = vld [vmem:[%s794_s5 + $0x8] sm:$0xff]   ;;  %v576_v57 = vld [vmem:[%s794_s5 + $0x10] sm:$0xff]  }
  0x19   :  { %v735_v46 = vld [vmem:[%s793_s4] sm:$0x1]  ;;  %v577_v58 = vld [vmem:[%s794_s5 + $0x18] sm:$0xff]   ;;  %v579_v60 = vld [vmem:[%s794_s5 + $0x28] sm:$0xff]   ;;  %p593_p3 = por %p592_p2, %p591_p1 }
  0x1a   :  { %508 = vmatpush3.bf16.msra.mxu0 %v564_v7  ;;  %v574_v55 = vld [vmem:[%s794_s5] sm:$0xff]   ;;  %v580_v61 = vld [vmem:[%s794_s5 + $0x30] sm:$0xff]   ;;  %v581_v62 = vld [vmem:[%s794_s5 + $0x38] sm:$0xff]  }
  0x1b   :  { %509 = vmatprep.subr.bf16.mxu0 %v610_v1  ;;  %518 = vmatpush3.bf16.msra.mxu1 %v567_v11  ;;  %v578_v59 = vld [vmem:[%s794_s5 + $0x20] sm:$0xff]   ;;  %p594_p4 = pnand %p593_p3, %p587_p0 }
  0x1c   :  { %519 = vmatprep.subr.bf16.mxu1 %v610_v1 }
  0x1e   :  { %510 = vmatpush3.bf16.msra.mxu0 %v565_v8 }
  0x1f   :  { %535 = vmatprep.subr.bf16.mxu0 %v610_v1  ;;  %520 = vmatpush3.bf16.msra.mxu1 %v568_v12 }
  0x20   :  { %521 = vmatprep.subr.bf16.mxu1 %v610_v1 }
  0x21   :  { %512 = vmatmul.mubr.bf16.vlgmr.msra.gmra.mrb[0].mxu0 %v34_v9 }
  0x22   :  { %551 = vmatprep.mubr.msk.bf16.mxu0 %vm611_vm0, %v610_v1  ;;  %536 = vmatpush3.bf16.msra.mxu0 %v574_v55 }
  0x23   :  { %522 = vmatpush3.bf16.msra.mxu1 %v569_v13  ;;  %537 = vmatprep.subr.bf16.mxu0 %v610_v1 }
  0x24   :  { %523 = vmatprep.subr.bf16.mxu1 %v610_v1 }
  0x26   :  { %538 = vmatpush3.bf16.msra.mxu0 %v575_v56 }
  0x27   :  { %524 = vmatpush3.bf16.msra.mxu1 %v570_v14  ;;  %539 = vmatprep.subr.bf16.mxu0 %v610_v1 }
  0x28   :  { %525 = vmatprep.subr.bf16.mxu1 %v610_v1 }
  0x2a   :  { %540 = vmatpush3.bf16.msra.mxu0 %v576_v57 }
  0x2b   :  { %526 = vmatpush3.bf16.msra.mxu1 %v571_v15  ;;  %541 = vmatprep.subr.bf16.mxu0 %v610_v1 }
  0x2c   :  { %527 = vmatprep.subr.bf16.mxu1 %v610_v1 }
  0x2e   :  { %542 = vmatpush3.bf16.msra.mxu0 %v577_v58 }
  0x2f   :  { %528 = vmatpush3.bf16.msra.mxu1 %v572_v16  ;;  %543 = vmatprep.subr.bf16.mxu0 %v610_v1 }
  0x30   :  { %529 = vmatprep.subr.bf16.mxu1 %v610_v1 }
  0x32   :  { %544 = vmatpush3.bf16.msra.mxu0 %v578_v59 }
  0x33   :  { %530 = vmatpush3.bf16.msra.mxu1 %v573_v17  ;;  %545 = vmatprep.subr.bf16.mxu0 %v610_v1 }
  0x36   :  { %546 = vmatpush3.bf16.msra.mxu0 %v579_v60 }
  0x37   :  { %547 = vmatprep.subr.bf16.mxu0 %v610_v1 }
  0x3a   :  { %548 = vmatpush3.bf16.msra.mxu0 %v580_v61 }
  0x3b   :  { %549 = vmatprep.subr.bf16.mxu0 %v610_v1 }
  0x3e   :  { %550 = vmatpush3.bf16.msra.mxu0 %v581_v62 }
  0xf4   :  { %v133_v18 = vpop.f32.mrb[0].mxu0 }
  0xf5   :  { %v139_v19 = vrot.slane %v133_v18, 4  ;;  %v146_v20 = vmul.f32 %v133_v18, %v133_v18  ;;  %v513_v21 = vpop.f32.mrb[1].mxu0 }
  0xf6   :  { %v136_v22 = vpop.f32.mrb[2].mxu0 }
  0xf7   :  { %v140_v23 = vadd.f32 %v139_v19, %v133_v18  ;;  %v147_v24 = vrot.slane %v146_v20, 4  ;;  %v514_v25 = vpop.f32.mrb[3].mxu0 }
  0xf9   :  { %v141_v26 = vrot.slane %v140_v23, 2  ;;  %v148_v27 = vadd.f32 %v147_v24, %v146_v20 }
  0xfb   :  { %v142_v28 = vadd.f32 %v141_v26, %v140_v23  ;;  %v149_v29 = vrot.slane %v148_v27, 2 }
  0xfd   :  { %v143_v30 = vrot.slane %v142_v28, 1  ;;  %v150_v31 = vadd.f32 %v149_v29, %v148_v27 }
  0xff   :  { %v144_v32 = vadd.f32 %v143_v30, %v142_v28  ;;  %v151_v33 = vrot.slane %v150_v31, 1 }
 0x101   :  { %v145_v34 = vmul.f32 0.125, %v144_v32  ;;  %v152_v35 = vadd.f32 %v151_v33, %v150_v31  ;;  %v459_v32 = vld [vmem:[%s795_s6] ss:$0 sm:$0xff] }
 0x103   :  { %v153_v36 = vmul.f32 0.125, %v152_v35  ;;  %v154_v37 = vmul.f32 %v145_v34, %v145_v34 }
 0x105   :  { %v155_v38 = vsub.f32 %v153_v36, %v154_v37 }
 0x107   :  { %v156_v39 = vadd.f32 1e-05, %v155_v38 }
 0x109   :  { %582 = vrsqrt.f32 %v156_v39 }
 0x113   :  { %v583_v44 = vpop.eup %582 }
 0x114   :  { %v158_v45 = vmul.f32 %v583_v44, %v32_v42 }
 0x116   :  { %v164_v47 = vrot.slane %v158_v45, %v730_v43  ;;  %v159_v48 = vmul.f32 %v158_v45, %v145_v34 }
 0x118   :  { %v160_v49 = vsub.f32 %v735_v46, %v159_v48  ;;  %v165_v50 = vmul.f32 %v164_v47, %v133_v18 }
 0x11a   :  { %v170_v51 = vrot.slane %v160_v49, %v730_v43 }
 0x11c   :  { %v172_v52 = vadd.f32 %v170_v51, %v165_v50 }
 0x11e   :  { %v173_v53 = vmax.f32 %v172_v52, 0.0 }
 0x120   :  { %v174_v54 = vpack.c.bf16 %v173_v53, %v173_v53 }
 0x122   :  { %532 = vmatmul.mubr.bf16.vlgmr.msra.gmra.mrb[0].mxu1 %v174_v54 }
 0x1f5   :  { %v273_v63 = vpop.f32.mrb[0].mxu1 }
 0x1f6   :  { %v279_v0 = vrot.slane %v273_v63, 4  ;;  %v286_v2 = vmul.f32 %v273_v63, %v273_v63  ;;  %v533_v3 = vpop.f32.mrb[1].mxu1 }
 0x1f7   :  { %v276_v4 = vpop.f32.mrb[2].mxu1 }
 0x1f8   :  { %v280_v5 = vadd.f32 %v279_v0, %v273_v63  ;;  %v287_v6 = vrot.slane %v286_v2, 4  ;;  %v534_v7 = vpop.f32.mrb[3].mxu1 }
 0x1fa   :  { %v281_v8 = vrot.slane %v280_v5, 2  ;;  %v288_v9 = vadd.f32 %v287_v6, %v286_v2 }
 0x1fc   :  { %v282_v10 = vadd.f32 %v281_v8, %v280_v5  ;;  %v289_v11 = vrot.slane %v288_v9, 2 }
 0x1fe   :  { %v283_v12 = vrot.slane %v282_v10, 1  ;;  %v290_v13 = vadd.f32 %v289_v11, %v288_v9 }
 0x200   :  { %v284_v14 = vadd.f32 %v283_v12, %v282_v10  ;;  %v291_v15 = vrot.slane %v290_v13, 1 }
 0x202   :  { %v285_v16 = vmul.f32 0.125, %v284_v14  ;;  %v292_v17 = vadd.f32 %v291_v15, %v290_v13 }
 0x204   :  { %v293_v1 = vmul.f32 0.125, %v292_v17  ;;  %v294_v18 = vmul.f32 %v285_v16, %v285_v16 }
 0x206   :  { %v295_v19 = vsub.f32 %v293_v1, %v294_v18 }
 0x208   :  { %v296_v20 = vadd.f32 1e-05, %v295_v19 }
 0x20a   :  { %584 = vrsqrt.f32 %v296_v20 }
 0x214   :  { %v585_v21 = vpop.eup %584 }
 0x215   :  { %v298_v22 = vmul.f32 %v585_v21, %v32_v42 }
 0x217   :  { %v299_v23 = vmul.f32 %v298_v22, %v285_v16  ;;  %v304_v24 = vrot.slane %v298_v22, %v730_v43 }
 0x219   :  { %v300_v25 = vsub.f32 %v735_v46, %v299_v23  ;;  %v305_v26 = vmul.f32 %v304_v24, %v273_v63 }
 0x21b   :  { %v310_v27 = vrot.slane %v300_v25, %v730_v43 }
 0x21d   :  { %v312_v28 = vadd.f32 %v310_v27, %v305_v26 }
 0x21f   :  { %v313_v29 = vmax.f32 %v312_v28, 0.0 }
 0x221   :  { %v314_v30 = vpack.c.bf16 %v313_v29, %v313_v29 }
 0x223   :  { %315 = vst [vmem:[#allocation2] sm:$0xf] %v314_v30 }
 0x22a   :  { %v316_v31 = vld [vmem:[#allocation2] sm:$0xf] }
 0x22b   :  { %552 = vmatmul.mubr.bf16.vlgmr.msra.gmra.mrb[4].mxu0 %v316_v31 }
 0x2fe   :  { %v422_v33 = vpop.f32.mrb[4].mxu0 }
 0x2ff   :  { %v423_v34 = vadd.f32 %v459_v32, %v422_v33  ;;  %v553_v35 = vpop.f32.mrb[5].mxu0 }
 0x300   :  { %v425_v36 = vpop.f32.mrb[6].mxu0 }
 0x301   :  { %428 = vst [vmem:[#allocation3] sm:$0xff] %v423_v34  ;;  %v554_v37 = vpop.f32.mrb[7].mxu0 }
 0x302   :  { %597 = shalt.err (!%p594_p4)
}
 0x303   :  { %s598_s6 = scalar_lea.hbm %s796_s7, 128 }
 0x304   :  { %p599_p5 = scmp.ne.s32.totalorder %s796_s7, %s598_s6  ;;  %p602_p6 = scmp.lt.u32.totalorder %s598_s6, %s796_s7 }
 0x306   :  { %p604_p7 = pnand %p602_p6, %p599_p5 }
 0x308   :  { %607 = shalt.err (!%p604_p7)
}
 0x309   :  { %438 = dma.vmem_to_hbm [thread:$0]  %s436_s27, 128, %s796_s7, [#allocation4]  }
 0x30a   :  { %608 = dma.done.wait [#allocation4], 128  }
 0x30b   :  { %609 = vsyncadd [#allocation4], 4294967168 }
 0x30c   :  { %442 = vsyncpa [#allocation4], 1 }

</bundles_post_ra>
